<compile_context>
chip_gen: v6e
topology: v6e:2x2x1
jax: 0.10.0
libtpu: 0.0.40
codegen_flags: <defaults>
</compile_context>

<pallas_src>
from functools import partial

import numpy as np
import jax
import jax.numpy as jnp
from jax.experimental import pallas as pl
from jax.experimental.pallas import tpu as pltpu


def _reflect_pad_kernel(x_ref, o_ref, *, p, H, W):
    # x_ref : (Cb, H, W)   input channel block (native dtype)
    # o_ref : (Cb, Hp, Wp) output channel block, Hp = H + 2p, Wp = W + 2p
    cb = x_ref.shape[0]
    Wp = W + 2 * p

    x = x_ref[...]
    compute_dt = x.dtype if jnp.issubdtype(x.dtype, jnp.floating) else jnp.float32
    xc = x.astype(compute_dt)

    # Column (lane-axis) reflection selection matrix, built in-kernel:
    #   pcol_t[w, q] = 1  iff  reflect(q - p) == w          shape (W, Wp)
    q_idx = jax.lax.broadcasted_iota(jnp.int32, (W, Wp), 1)
    w_idx = jax.lax.broadcasted_iota(jnp.int32, (W, Wp), 0)
    src = jnp.abs(q_idx - p)
    src = jnp.where(src >= W, 2 * (W - 1) - src, src)
    pcol_t = (src == w_idx).astype(compute_dt)

    # Width reflection for all Cb*H rows in a single MXU matmul (0/1 matrix,
    # exact selection; no f32 upcast of the data path for bf16 inputs).
    y = jnp.dot(xc.reshape(cb * H, W), pcol_t, preferred_element_type=compute_dt)
    y = y.reshape(cb, H, Wp).astype(o_ref.dtype)

    # Height reflection: one big central store + 2p boundary-row copies.
    o_ref[:, p:p + H, :] = y
    for o in range(p):                       # top rows: out row o <- input row p - o
        o_ref[:, o:o + 1, :] = y[:, p - o:p - o + 1, :]
    for j in range(p):                       # bottom rows: out row p+H+j <- input row H-2-j
        o_ref[:, p + H + j:p + H + j + 1, :] = y[:, H - 2 - j:H - 2 - j + 1, :]


def _pick_channel_block(nc, h, w, hp, wp, itemsize):
    """Largest divisor of nc that keeps VMEM use modest and >=2 grid steps."""
    # double-buffered input block + output block per step; budget well under
    # the v7x default scoped-VMEM limit (32 MiB of 64 MiB physical).
    budget = 8 * 1024 * 1024
    per_c = (h * w + hp * wp) * itemsize * 2
    max_cb = max(1, budget // per_c)
    if nc >= 2:
        max_cb = min(max_cb, nc // 2)        # keep >=2 grid steps (v7x: 2 TCs)
    cb = 1
    for d in range(1, nc + 1):
        if nc % d == 0 and d <= max_cb:
            cb = d
    return cb


def custom_pad(x, padding):
    """Reflect-pad the last two dims of an NCHW tensor by `padding` on each side."""
    N, C, H, W = x.shape
    p = int(padding)
    if p == 0:
        return x
    assert 0 < p < H and p < W, "reflect padding requires pad < spatial size"
    Hp, Wp = H + 2 * p, W + 2 * p

    NC = N * C
    xf = x.reshape(NC, H, W)

    itemsize = int(np.dtype(x.dtype).itemsize)
    cb = _pick_channel_block(NC, H, W, Hp, Wp, itemsize)
    grid = (NC // cb,)

    kernel = partial(_reflect_pad_kernel, p=p, H=H, W=W)

    cost = pl.CostEstimate(
        flops=2 * NC * H * W * Wp,
        transcendentals=0,
        bytes_accessed=NC * (H * W + Hp * Wp) * itemsize,
    )

    out = pl.pallas_call(
        kernel,
        out_shape=jax.ShapeDtypeStruct((NC, Hp, Wp), x.dtype),
        grid_spec=pltpu.PrefetchScalarGridSpec(
            num_scalar_prefetch=0,
            grid=grid,
            in_specs=[pl.BlockSpec((cb, H, W), lambda i: (i, 0, 0))],
            out_specs=pl.BlockSpec((cb, Hp, Wp), lambda i: (i, 0, 0)),
        ),
        compiler_params=pltpu.CompilerParams(
            dimension_semantics=("parallel",),
        ),
        cost_estimate=cost,
    )(xf)

    return out.reshape(N, C, Hp, Wp)


if __name__ == "__main__":
    key = jax.random.PRNGKey(0)
    N, C, H, W = 2, 4, 16, 16
    padding = 2

    x = jax.random.normal(key, (N, C, H, W), dtype=jnp.float32)

    out = jax.block_until_ready(custom_pad(x, padding))

    # Reference: jnp.pad 'reflect' matches PyTorch F.pad(mode='reflect').
    ref = jnp.pad(
        x, ((0, 0), (0, 0), (padding, padding), (padding, padding)), mode="reflect"
    )
    assert out.shape == (N, C, H + 2 * padding, W + 2 * padding)
    np.testing.assert_allclose(np.asarray(out), np.asarray(ref), rtol=1e-6, atol=1e-6)

    print("KERNEL_OK")
</pallas_src>

<mosaic_0001>
module attributes {stable_mosaic.version = 11 : i64} {
  func.func @_reflect_pad_kernel(%arg0: i32, %arg1: memref<4x16x16xf32, #tpu.memory_space<vmem>>, %arg2: memref<4x20x20xf32, #tpu.memory_space<vmem>>) attributes {dimension_semantics = [#tpu.dimension_semantics<parallel>], iteration_bounds = array<i64: 2>, scalar_prefetch = 0 : i64, scratch_operands = 0 : i64, tpu.core_type = #tpu.core_type<tc>, window_params = [{transform_indices = @transform_0, window_bounds = array<i64: 4, 16, 16>}, {transform_indices = @transform_1, window_bounds = array<i64: 4, 20, 20>}]} {
    %c0 = arith.constant 0 : index
    %c0_0 = arith.constant 0 : index
    %c0_1 = arith.constant 0 : index
    %0 = vector.load %arg1[%c0, %c0_0, %c0_1] : memref<4x16x16xf32, #tpu.memory_space<vmem>>, vector<4x16x16xf32>
    %1 = tpu.iota {dimensions = array<i32: 1>} : vector<16x20xi32>
    %2 = tpu.iota {dimensions = array<i32: 0>} : vector<16x20xi32>
    %c2_i32 = arith.constant 2 : i32
    %3 = vector.broadcast %c2_i32 : i32 to vector<16x20xi32>
    %4 = arith.subi %1, %3 : vector<16x20xi32>
    %5 = math.absi %4 : vector<16x20xi32>
    %c16_i32 = arith.constant 16 : i32
    %6 = vector.broadcast %c16_i32 : i32 to vector<16x20xi32>
    %7 = arith.cmpi sge, %5, %6 : vector<16x20xi32>
    %c30_i32 = arith.constant 30 : i32
    %8 = vector.broadcast %c30_i32 : i32 to vector<16x20xi32>
    %9 = arith.subi %8, %5 : vector<16x20xi32>
    %10 = arith.select %7, %9, %5 : vector<16x20xi1>, vector<16x20xi32>
    %11 = arith.cmpi eq, %10, %2 : vector<16x20xi32>
    %12 = arith.extui %11 : vector<16x20xi1> to vector<16x20xi32>
    %13 = arith.sitofp %12 : vector<16x20xi32> to vector<16x20xf32>
    %14 = vector.shape_cast %0 : vector<4x16x16xf32> to vector<64x16xf32>
    %cst = arith.constant dense<0.000000e+00> : vector<64x20xf32>
    %15 = tpu.matmul %14, %13, %cst {dimension_numbers = #tpu.dot_dimension_numbers<[1], [0], [0], [1], [0, 0, 1, 1], [], []>} : vector<64x16xf32>, vector<16x20xf32>, vector<64x20xf32> -> vector<64x20xf32>
    %16 = vector.shape_cast %15 : vector<64x20xf32> to vector<4x16x20xf32>
    %c0_2 = arith.constant 0 : index
    %c2 = arith.constant 2 : index
    %c0_3 = arith.constant 0 : index
    %17 = vector.load %arg2[%c0_2, %c2, %c0_3] : memref<4x20x20xf32, #tpu.memory_space<vmem>>, vector<4x16x20xf32>
    tpu.vector_store %arg2[%c0_2, %c2, %c0_3], %16 {strides = array<i32>} : memref<4x20x20xf32, #tpu.memory_space<vmem>>, vector<4x16x20xf32>,
    %18 = vector.extract_strided_slice %16 {offsets = [0, 2, 0], sizes = [4, 1, 20], strides = [1, 1, 1]} : vector<4x16x20xf32> to vector<4x1x20xf32>
    %c0_4 = arith.constant 0 : index
    %c0_5 = arith.constant 0 : index
    %c0_6 = arith.constant 0 : index
    %19 = vector.load %arg2[%c0_4, %c0_5, %c0_6] : memref<4x20x20xf32, #tpu.memory_space<vmem>>, vector<4x1x20xf32>
    tpu.vector_store %arg2[%c0_4, %c0_5, %c0_6], %18 {strides = array<i32>} : memref<4x20x20xf32, #tpu.memory_space<vmem>>, vector<4x1x20xf32>,
    %20 = vector.extract_strided_slice %16 {offsets = [0, 1, 0], sizes = [4, 1, 20], strides = [1, 1, 1]} : vector<4x16x20xf32> to vector<4x1x20xf32>
    %c0_7 = arith.constant 0 : index
    %c1 = arith.constant 1 : index
    %c0_8 = arith.constant 0 : index
    %21 = vector.load %arg2[%c0_7, %c1, %c0_8] : memref<4x20x20xf32, #tpu.memory_space<vmem>>, vector<4x1x20xf32>
    tpu.vector_store %arg2[%c0_7, %c1, %c0_8], %20 {strides = array<i32>} : memref<4x20x20xf32, #tpu.memory_space<vmem>>, vector<4x1x20xf32>,
    %22 = vector.extract_strided_slice %16 {offsets = [0, 14, 0], sizes = [4, 1, 20], strides = [1, 1, 1]} : vector<4x16x20xf32> to vector<4x1x20xf32>
    %c0_9 = arith.constant 0 : index
    %c18 = arith.constant 18 : index
    %c0_10 = arith.constant 0 : index
    %23 = vector.load %arg2[%c0_9, %c18, %c0_10] : memref<4x20x20xf32, #tpu.memory_space<vmem>>, vector<4x1x20xf32>
    tpu.vector_store %arg2[%c0_9, %c18, %c0_10], %22 {strides = array<i32>} : memref<4x20x20xf32, #tpu.memory_space<vmem>>, vector<4x1x20xf32>,
    %24 = vector.extract_strided_slice %16 {offsets = [0, 13, 0], sizes = [4, 1, 20], strides = [1, 1, 1]} : vector<4x16x20xf32> to vector<4x1x20xf32>
    %c0_11 = arith.constant 0 : index
    %c19 = arith.constant 19 : index
    %c0_12 = arith.constant 0 : index
    %25 = vector.load %arg2[%c0_11, %c19, %c0_12] : memref<4x20x20xf32, #tpu.memory_space<vmem>>, vector<4x1x20xf32>
    tpu.vector_store %arg2[%c0_11, %c19, %c0_12], %24 {strides = array<i32>} : memref<4x20x20xf32, #tpu.memory_space<vmem>>, vector<4x1x20xf32>,
    return
  }
  func.func @transform_0(%arg0: i32) -> (i32, i32, i32) {
    %c0_i32 = arith.constant 0 : i32
    %c0_i32_0 = arith.constant 0 : i32
    %c0_i32_1 = arith.constant 0 : i32
    return %arg0, %c0_i32, %c0_i32_0 : i32, i32, i32
  }
  func.func @transform_1(%arg0: i32) -> (i32, i32, i32) {
    %c0_i32 = arith.constant 0 : i32
    %c0_i32_0 = arith.constant 0 : i32
    %c0_i32_1 = arith.constant 0 : i32
    return %arg0, %c0_i32, %c0_i32_0 : i32, i32, i32
  }
}

</mosaic_0001>

<bundles_post_ra>
// kernel: tpu_custom_call.1
= control target key start
LH: loop header
LB: loop body
LE: loop exit
PB: predicated region body
PF: predicated region fallthrough
CT: control target
= control target key end

     0   :  { %6 = vsyncpa [#allocation3], 0  ;;  %s745_s0 = inlined_call_operand.hbm [shape: f32[8,16,16], index: 0, kind: input, shape index: {}]   ;;  %s746_s1 = inlined_call_operand.vmem [shape: f32[8,20,20], index: 1, kind: output, shape index: {}]  }
   0x1   :  { %8 = vsyncpa [#allocation3 + $0x1], 0  ;;  %s577_s6 = smov 0   ;;  %s579_s7 = smov 0  }
   0x2   :  { %s581_s8 = smov 0   ;;  %s583_s9 = smov 0  }
   0x3 LB: > { %s396_s10 = sadd.s32 4294967295, %s561_s9   ;;  %s597_s11 = sadd.s32 1, %s561_s9   ;;  %s561_s9 = sphi %s583_s9, %s755_s9   ;;  %s557_s8 = sphi %s581_s8, %s754_s8   ;;  %s553_s7 = sphi %s579_s7, %s753_s7   ;;  %s549_s6 = sphi %s577_s6, %s752_s6  }
   0x4   : > { %s18_s12 = ssub.s32 %s561_s9, %s597_s11  ;;  %s21_s13 = sadd.s32 1, %s557_s8 }
   0x5   : > { %p19_p0 = scmp.eq.s32.totalorder %s18_s12, 0  ;;  %p28_p1 = scmp.ne.s32.totalorder %s557_s8, %s553_s7 }
   0x6   : > { %p29_p2 = scmp.eq.s32.totalorder %s561_s9, 0  ;;  %p34_p3 = scmp.ne.s32.totalorder %s553_s7, %s549_s6 }
   0x7   : > { %s607_s14 = scalar_select %p19_p0, %s557_s8, %s21_s13  }
   0x8   : > { %p30_p4 = por %p29_p2, %p28_p1  ;;  %p35_p5 = scmp.eq.s32.totalorder %s396_s10, 0 }
   0x9   : > { %p463_p6 = scmp.lt.s32.totalorder %s561_s9, 2  ;;  %s84_s16 = sand.u32 1, %s557_s8  }
   0xa   : > { %p612_p7 = por %p35_p5, %p34_p3  ;;  %s400_s17 = sshll.u32 %s84_s16, 6 }
   0xb   : > { %s425_s18 = sshll.u32 %s561_s9, 10  ;;  %s88_s22 = scalar_lea.vmem [#allocation2], %s400_s17 }
   0xc   : > { %s748_s15 = scalar_select %p612_p7, 1, 0 }
   0xd   : > { %s621_s21 = scalar_lea.hbm %s745_s0, %s425_s18  ;;  %s96_s23 = sshll.u32 %s88_s22, 4  ;;  %s623_s23 = int_to_ptr.vmem [resolvable:$true] %s96_s23 }
   0xe   : > { %p625_p8 = pnand %p463_p6, %p30_p4  ;;  %s630_s25 = scalar_lea.sflag [#allocation3], %s84_s16 }
   0xf   : > { %s499_s26 = scalar_lea.hbm %s621_s21, 1024  ;;  %s504_s29 = scalar_lea.hbm %s745_s0, 2048 }
  0x10   : > { %p500_p10 = scmp.ne.s32.totalorder %s621_s21, %s499_s26  ;;  %p501_p11 = pneg %p625_p8 }
  0x11   : > { %p505_p0 = scmp.lt.s32.totalorder %s621_s21, %s745_s0  ;;  %p506_p1 = scmp.lt.s32.totalorder %s504_s29, %s499_s26 }
  0x12   : > { %p502_p12 = pnand %p501_p11, %p500_p10 }
  0x13   : > { %p507_p2 = por %p506_p1, %p505_p0 }
  0x14   : > { %p503_p13 = pneg %p502_p12 }
  0x16   : > { %p508_p3 = pnand %p507_p2, %p503_p13 }
  0x18   : > { %511 = shalt.err (!%p508_p3)
}
  0x19   : > { %s512_s3 = scalar_lea.vmem %s623_s23, 1024  ;;  %s563_s4 = smov [#allocation2]  }
  0x1a   : > { %p513_p4 = scmp.ne.s32.totalorder %s623_s23, %s512_s3  ;;  %s517_s5 = sshll.u32 %s563_s4, 4  ;;  %s518_s5 = int_to_ptr.vmem [resolvable:$false] %s517_s5 }
  0x1b   : > { %s519_s6 = scalar_lea.vmem %s518_s5, 2048  ;;  %p520_p10 = scmp.lt.s32.totalorder %s623_s23, %s518_s5 }
  0x1c   : > { %p515_p5 = pnand %p513_p4, %p501_p11  ;;  %p521_p12 = scmp.lt.s32.totalorder %s519_s6, %s512_s3 }
  0x1e   : > { %p516_p6 = pneg %p515_p5  ;;  %p522_p9 = por %p521_p12, %p520_p10 }
  0x20   : > { %p523_p7 = pnand %p522_p9, %p516_p6 }
  0x22   : > { %526 = shalt.err (!%p523_p7)
}
  0x23   : > { %s564_s12 = smov 128   ;;  %s565_s13 = smov 8  }
  0x24   : > { %462 = dma.hbm_to_vmem [thread:$0]  (!%p625_p8), %s621_s21, 1024, %s623_s23, %s630_s25, %s564_s12, %s564_s12, %s565_s13  }
  0x25   : > { %p104_p11 = scmp.lt.s32.totalorder %s561_s9, 3  ;;  %p750_p13 = scmp.ge.s32.totalorder %s561_s9, 1 }
  0x27   : > { %p105_p0 = pnand %p750_p13, %p104_p11 }
  0x28   : > { %s110_s16 = sand.u32 (!%p105_p0), 1, %s553_s7   ;;  %p751_p7 = scmp.ne.s32.totalorder (!%p105_p0), %s748_s15, 0 }
  0x29   : > { %108 = sbr.rel (%p105_p0) target bundleno = 270 (0x10e), region = 24  ;;  %s405_s17 = sshll.u32 (!%p105_p0), %s110_s16, 6 }
  0x2a   : > { %s111_s18 = scalar_lea.sflag (!%p105_p0), [#allocation3], %s110_s16  ;;  %s655_s19 = scalar_lea.vmem (!%p105_p0), [#allocation2], %s405_s17 }
  0x2e   : > { %544 = dma.done.wait (%p751_p7), %s111_s18, 1024  }
  0x2f   : > { %546 = vsyncadd (%p751_p7), %s111_s18, 4294966272  ;;  %v150_v0 = vlaneseq  ;;  %vm168_vm0 = vcmask 130048   ;;  %v142_v5 = vld [vmem:[%s655_s19] sm:$0xff]  ;;  %v566_v11 = vmov 1.0   ;;  %v143_v12 = vld [vmem:[%s655_s19 + $0x8] sm:$0xff]  ;;  %s406_s15 = sshll.u32 %s396_s10, 2 }
  0x30   : > { %v146_v6 = vld [vmem:[%s655_s19 + $0x20] sm:$0xff]  ;;  %440 = vmatprep.mubr.msk.f32.mxu0 %vm168_vm0, %v142_v5  ;;  %v147_v13 = vld [vmem:[%s655_s19 + $0x28] sm:$0xff]  ;;  %v144_v14 = vld [vmem:[%s655_s19 + $0x10] sm:$0xff]  ;;  %p136_p8 = scmp.lt.s32.totalorder %s406_s15, 7  ;;  %vm298_vm4 = vcmask 162816   ;;  %vm317_vm5 = vcmask 161798  }
  0x31   : > { %v151_v1 = vand.u32 127, %v150_v0  ;;  %v153_v3 = vshrl.u32 %v150_v0, 7  ;;  %446 = vmatprep.mubr.msk.f32.mxu1 %vm168_vm0, %v146_v6  ;;  %v148_v15 = vld [vmem:[%s655_s19 + $0x30] sm:$0xff]  ;;  %v145_v16 = vld [vmem:[%s655_s19 + $0x18] sm:$0xff]  ;;  %vm322_vm6 = vcmask 160773   ;;  %vm307_vm7 = vcmask 157698  }
  0x32   : > { %v149_v17 = vld [vmem:[%s655_s19 + $0x38] sm:$0xff]  ;;  %s757_s15 = smov (!%p136_p8, %s406_s15), 7  ;;  %vm312_vm8 = vcmask 156673  }
  0x33   : > { %v408_v2 = vadd.s32 4294967294, %v151_v1  ;;  %v154_v8 = vadd.s32 8, %v153_v3  ;;  %s456_s20 = smul.u32 24, %s757_s15 }
  0x35   : > { %v157_v4 = vsub.s32 0, %v408_v2  ;;  %s682_s23 = scalar_lea.vmem %s746_s1, %s456_s20 }
  0x37   : > { %v409_v7 = vmin.u32 %v408_v2, %v157_v4 }
  0x39   : > { %vm159_vm1 = vcmp.ge.s32.totalorder %v409_v7, 16  ;;  %v160_v9 = vsub.s32 30, %v409_v7 }
  0x3b   : > { %v161_v10 = vsel %vm159_vm1, %v160_v9, %v409_v7 }
  0x3c   : > { %vm163_vm2 = vcmp.eq.s32.totalorder %v161_v10, %v154_v8  ;;  %vm162_vm3 = vcmp.eq.s32.totalorder %v161_v10, %v153_v3 }
  0x3d   : > { %436 = vmatprep.subr.msk.mxu0 %vm163_vm2, %v566_v11  ;;  %452 = vmatprep.subr.msk.mxu1 %vm163_vm2, %v566_v11 }
  0x3e   : > { %437 = vmatpush3.msk.msra.mxu0 %vm163_vm2, %v566_v11  ;;  %454 = vmatpush3.msk.msra.mxu1 %vm163_vm2, %v566_v11 }
  0x3f   : > { %438 = vmatprep.subr.msk.mxu0 %vm162_vm3, %v566_v11  ;;  %453 = vmatprep.subr.msk.mxu1 %vm162_vm3, %v566_v11 }
  0x40   : > { %439 = vmatpush3.msk.msra.mxu0 %vm162_vm3, %v566_v11  ;;  %455 = vmatpush3.msk.msra.mxu1 %vm162_vm3, %v566_v11 }
  0x41   : > { %441 = vmatmul.mubr.msk.f32.vlgmr.msra.gmra.mxu0 %vm168_vm0, %v143_v12  ;;  %447 = vmatmul.mubr.msk.f32.vlgmr.msra.gmra.mxu1 %vm168_vm0, %v147_v13 }
  0x42   : > { %443 = vmatprep.mubr.msk.f32.mxu0 %vm168_vm0, %v144_v14  ;;  %449 = vmatprep.mubr.msk.f32.mxu1 %vm168_vm0, %v148_v15 }
  0x45   : > { %444 = vmatmul.mubr.msk.f32.gmra.mxu0 %vm168_vm0, %v145_v16  ;;  %450 = vmatmul.mubr.msk.f32.gmra.mxu1 %vm168_vm0, %v149_v17 }
 0x101   : > { %v442_v18 = vpop.f32.mrf.mxu0  ;;  %v448_v19 = vpop.f32.mrf.mxu1 }
 0x102   : > { %300 = vst.msk [vmem:[%s682_s23 + $0xa] sm:$0xff] %vm298_vm4, %v442_v18  ;;  %304 = vst.msk [vmem:[%s682_s23 + $0x3a] sm:$0xff] %vm298_vm4, %v448_v19 }
 0x103   : > { %318 = vst.msk [vmem:[%s682_s23 + $0xc] sm:$0x40] %vm317_vm5, %v442_v18  ;;  %v259_v20 = vpop.f32.mrf.mxu0  ;;  %v279_v21 = vpop.f32.mrf.mxu1  ;;  %320 = vst.msk [vmem:[%s682_s23 + $0x3c] sm:$0x40] %vm317_vm5, %v448_v19 }
 0x104   : > { %323 = vst.msk [vmem:[%s682_s23 + $0xe] sm:$0x20] %vm322_vm6, %v442_v18  ;;  %325 = vst.msk [vmem:[%s682_s23 + $0x3e] sm:$0x20] %vm322_vm6, %v448_v19 }
 0x105   : > { %299 = vst.msk [vmem:[%s682_s23 + $0x2] sm:$0xff] %vm298_vm4, %v259_v20  ;;  %v445_v22 = vpop.f32.mrf.mxu0  ;;  %v451_v23 = vpop.f32.mrf.mxu1  ;;  %303 = vst.msk [vmem:[%s682_s23 + $0x32] sm:$0xff] %vm298_vm4, %v279_v21 }
 0x106   : > { %308 = vst.msk [vmem:[%s682_s23 - $0x2] sm:$0x4] %vm307_vm7, %v259_v20  ;;  %310 = vst.msk [vmem:[%s682_s23 + $0x2e] sm:$0x4] %vm307_vm7, %v279_v21 }
 0x107   : > { %313 = vst.msk [vmem:[%s682_s23] sm:$0x2] %vm312_vm8, %v259_v20  ;;  %v269_v24 = vpop.f32.mrf.mxu0  ;;  %315 = vst.msk [vmem:[%s682_s23 + $0x30] sm:$0x2] %vm312_vm8, %v279_v21  ;;  %v289_v25 = vpop.f32.mrf.mxu1 }
 0x108   : > { %302 = vst.msk [vmem:[%s682_s23 + $0x22] sm:$0xff] %vm298_vm4, %v445_v22  ;;  %306 = vst.msk [vmem:[%s682_s23 + $0x52] sm:$0xff] %vm298_vm4, %v451_v23 }
 0x109   : > { %319 = vst.msk [vmem:[%s682_s23 + $0x24] sm:$0x40] %vm317_vm5, %v445_v22  ;;  %321 = vst.msk [vmem:[%s682_s23 + $0x54] sm:$0x40] %vm317_vm5, %v451_v23 }
 0x10a   : > { %324 = vst.msk [vmem:[%s682_s23 + $0x26] sm:$0x20] %vm322_vm6, %v445_v22  ;;  %326 = vst.msk [vmem:[%s682_s23 + $0x56] sm:$0x20] %vm322_vm6, %v451_v23 }
 0x10b   : > { %301 = vst.msk [vmem:[%s682_s23 + $0x1a] sm:$0xff] %vm298_vm4, %v269_v24  ;;  %305 = vst.msk [vmem:[%s682_s23 + $0x4a] sm:$0xff] %vm298_vm4, %v289_v25 }
 0x10c   : > { %309 = vst.msk [vmem:[%s682_s23 + $0x16] sm:$0x4] %vm307_vm7, %v269_v24  ;;  %311 = vst.msk [vmem:[%s682_s23 + $0x46] sm:$0x4] %vm307_vm7, %v289_v25 }
 0x10d   : > { %314 = vst.msk [vmem:[%s682_s23 + $0x18] sm:$0x2] %vm312_vm8, %v269_v24  ;;  %316 = vst.msk [vmem:[%s682_s23 + $0x48] sm:$0x2] %vm312_vm8, %v289_v25 }
 0x10e PF: > { %p11_p9 = scmp.ge.s32.totalorder %s597_s11, 4   ;;  %s752_s6 = smov %s553_s7 }
 0x10f   : > { %s753_s7 = smov %s557_s8  ;;  %s754_s8 = smov %s607_s14 }
 0x110   : > { %s755_s9 = smov %s597_s11  ;;  %13 = sbr.rel (!%p11_p9) target bundleno = 3 (0x3), region = 64 }
 0x115   :  { %351 = vsyncpa [#allocation3], 1 }
 0x116   :  { %353 = vsyncpa [#allocation3 + $0x1], 1 }

</bundles_post_ra>
